<compile_context>
chip_gen: v5e
topology: v5e:2x2
jax: 0.10.0
libtpu: 0.0.40
codegen_flags: <defaults>
</compile_context>

<pallas_src>
import jax
import jax.numpy as jnp
from jax.experimental import pallas as pl
from jax.experimental.pallas import tpu as pltpu


def _round_up(x, m):
    return ((x + m - 1) // m) * m


def _kernel_config():
    """Per-TPU-generation tile sizes and VMEM budget."""
    try:
        kind = jax.devices()[0].device_kind.lower()
    except Exception:  # pragma: no cover - defensive
        kind = ""
    if "v7" in kind or "7x" in kind:
        # v7x: 64 MiB physical VMEM per TensorCore -> leave headroom.
        return dict(tile_m_max=512, tile_v=2048, vmem_limit=48 * 1024 * 1024)
    if "v6" in kind:
        # v6e: 128 MiB VMEM, highest FLOP/byte roofline -> big tiles.
        return dict(tile_m_max=512, tile_v=4096, vmem_limit=96 * 1024 * 1024)
    if "v5" in kind:
        return dict(tile_m_max=512, tile_v=4096, vmem_limit=96 * 1024 * 1024)
    # Unknown generation: conservative (v7x-safe) settings.
    return dict(tile_m_max=512, tile_v=2048, vmem_limit=48 * 1024 * 1024)


def _choose_tile_m(rows, tile_m_max):
    # bf16 sublane packing -> keep row tiles a multiple of 16.
    if rows <= tile_m_max:
        return max(16, _round_up(rows, 16))
    return tile_m_max


def prepare_masklm_params(params, tile_v=None):
    """One-time (model-init) parameter prep.

    Casts / pads the big output-projection weight once so the per-call hot
    path never re-materializes an H x V bf16 copy of w2 in HBM.
    """
    cfg = _kernel_config()
    if tile_v is None:
        tile_v = cfg["tile_v"]
    w1, b1, gamma, beta, w2, b2 = params
    D, H = w1.shape
    V = w2.shape[1]
    tile_v = min(tile_v, _round_up(V, 128))
    v_p = _round_up(V, tile_v)

    w2_p = jnp.zeros((H, v_p), jnp.bfloat16).at[:, :V].set(w2.astype(jnp.bfloat16))
    b2_p = jnp.zeros((1, v_p), jnp.float32).at[:, :V].set(
        b2.reshape(1, V).astype(jnp.float32))

    return {
        "w1": w1.astype(jnp.bfloat16),
        "b1": b1.reshape(1, H).astype(jnp.float32),
        "gamma": gamma.reshape(1, H).astype(jnp.float32),
        "beta": beta.reshape(1, H).astype(jnp.float32),
        "w2": w2_p,
        "b2": b2_p,
        "D": D, "H": H, "V": V,
        "tile_v": tile_v, "v_p": v_p,
    }


def _masklm_hidden_kernel(x_ref, w1_ref, b1_ref, g_ref, beta_ref, h_ref):
    """h = LayerNorm(ReLU(x @ w1 + b1)) * gamma + beta, stored as bf16."""
    x = x_ref[...]                                          # bf16 (TILE_M, D)
    h = jnp.dot(x, w1_ref[...], preferred_element_type=jnp.float32)
    h = jnp.maximum(h + b1_ref[...], 0.0)
    # LayerNorm(num_hiddens), eps = torch default 1e-5, stats in f32.
    mean = jnp.mean(h, axis=-1, keepdims=True)
    var = jnp.mean((h - mean) ** 2, axis=-1, keepdims=True)
    h = (h - mean) * jax.lax.rsqrt(var + 1e-5)
    h = h * g_ref[...] + beta_ref[...]
    h_ref[...] = h.astype(h_ref.dtype)


def _masklm_proj_kernel(h_ref, w2_ref, b2_ref, o_ref):
    """One (TILE_M, TILE_V) tile of logits = h @ w2 + b2."""
    y = jnp.dot(h_ref[...], w2_ref[...], preferred_element_type=jnp.float32)
    o_ref[...] = (y + b2_ref[...]).astype(o_ref.dtype)


def masklm_forward(X, pred_positions, prepared, out_dtype=jnp.float32):
    """X: (B, S, num_inputs) f32, pred_positions: (B, P) int32."""
    cfg = _kernel_config()
    B, S, D = X.shape
    P = pred_positions.shape[1]
    rows = B * P
    H, V = prepared["H"], prepared["V"]
    tile_v, v_p = prepared["tile_v"], prepared["v_p"]

    # Gather of masked positions (plain-JAX glue; (rows, D) is small vs w2).
    # TODO(synk): fold this gather into the Pallas pipeline via scalar-prefetch
    # row DMA so the (rows, D) slab never round-trips HBM for BERT-sized D.
    batch_idx = jnp.repeat(jnp.arange(B), P)
    masked_X = X[batch_idx, pred_positions.reshape(-1)]                 # (rows, D)

    tile_m = _choose_tile_m(rows, cfg["tile_m_max"])
    rows_p = _round_up(rows, tile_m)
    x_p = jnp.zeros((rows_p, D), jnp.bfloat16).at[:rows].set(
        masked_X.astype(jnp.bfloat16))

    vmem_limit = cfg["vmem_limit"]

    # ---- Stage 1: hidden activation, one pass over the row tiles. --------
    h = pl.pallas_call(
        _masklm_hidden_kernel,
        out_shape=jax.ShapeDtypeStruct((rows_p, H), jnp.bfloat16),
        grid=(rows_p // tile_m,),
        in_specs=[
            pl.BlockSpec((tile_m, D), lambda i: (i, 0)),
            # w1 / biases / LN affine are grid-invariant -> fetched once.
            # (If VMEM ever gets tight, these could be single-buffered via
            #  pipeline_mode=pl.Buffered(1).)
            pl.BlockSpec((D, H), lambda i: (0, 0)),
            pl.BlockSpec((1, H), lambda i: (0, 0)),
            pl.BlockSpec((1, H), lambda i: (0, 0)),
            pl.BlockSpec((1, H), lambda i: (0, 0)),
        ],
        out_specs=pl.BlockSpec((tile_m, H), lambda i: (i, 0)),
        compiler_params=pltpu.CompilerParams(
            dimension_semantics=("parallel",),
            vmem_limit_bytes=vmem_limit),
    )(x_p, prepared["w1"], prepared["b1"], prepared["gamma"], prepared["beta"])

    # ---- Stage 2: output projection, (row tile x vocab tile) grid. -------
    # No scratch dependency -> both axes "parallel" (v7x megacore friendly).
    # h block index is constant across the vocab axis, so it is DMA'd once
    # per row tile while w2 streams; with a single row tile w2 is read from
    # HBM exactly once.
    out = pl.pallas_call(
        _masklm_proj_kernel,
        out_shape=jax.ShapeDtypeStruct((rows_p, v_p), out_dtype),
        grid=(rows_p // tile_m, v_p // tile_v),
        in_specs=[
            pl.BlockSpec((tile_m, H), lambda i, j: (i, 0)),
            pl.BlockSpec((H, tile_v), lambda i, j: (0, j)),
            pl.BlockSpec((1, tile_v), lambda i, j: (0, j)),
        ],
        out_specs=pl.BlockSpec((tile_m, tile_v), lambda i, j: (i, j)),
        compiler_params=pltpu.CompilerParams(
            dimension_semantics=("parallel", "parallel"),
            vmem_limit_bytes=vmem_limit),
    )(h, prepared["w2"], prepared["b2"])

    # Slice off row / vocab padding and restore (B, P, V).
    return out[:rows, :V].reshape(B, P, V)                              # mlm_Y_hat


def _reference_forward(X, pred_positions, params, op_dtype=jnp.float32):
    """Pure-JAX reference; op_dtype controls the matmul operand precision."""
    w1, b1, gamma, beta, w2, b2 = params
    B = X.shape[0]
    P = pred_positions.shape[1]
    batch_idx = jnp.repeat(jnp.arange(B), P)
    m = X[batch_idx, pred_positions.reshape(-1)].reshape(B, P, -1)
    h = jnp.dot(m.astype(op_dtype), w1.astype(op_dtype),
                preferred_element_type=jnp.float32) + b1
    h = jnp.maximum(h, 0.0)
    mu = h.mean(-1, keepdims=True)
    var = ((h - mu) ** 2).mean(-1, keepdims=True)
    h = (h - mu) * jax.lax.rsqrt(var + 1e-5) * gamma + beta
    return jnp.dot(h.astype(op_dtype), w2.astype(op_dtype),
                   preferred_element_type=jnp.float32) + b2


if __name__ == "__main__":
    # Small, deterministic shapes consistent with the module.
    batch, seq, num_inputs = 2, 8, 128
    num_hiddens, vocab_size = 128, 256

    key = jax.random.PRNGKey(0)
    kx, k1, k2, k3, k4 = jax.random.split(key, 5)

    X = jax.random.normal(kx, (batch, seq, num_inputs), dtype=jnp.float32)
    pred_positions = jnp.array([[1, 5, 2], [6, 1, 5]], dtype=jnp.int32)

    # Deterministic parameter init (nn.Linear-style scaling, synthetic values).
    w1 = jax.random.normal(k1, (num_inputs, num_hiddens), jnp.float32) * (num_inputs ** -0.5)
    b1 = jax.random.normal(k2, (num_hiddens,), jnp.float32) * 0.01
    gamma = jnp.ones((num_hiddens,), jnp.float32)
    beta = jnp.zeros((num_hiddens,), jnp.float32)
    w2 = jax.random.normal(k3, (num_hiddens, vocab_size), jnp.float32) * (num_hiddens ** -0.5)
    b2 = jax.random.normal(k4, (vocab_size,), jnp.float32) * 0.01
    params = (w1, b1, gamma, beta, w2, b2)

    # One-time weight prep (hoisted out of the per-call hot path).
    prepared = prepare_masklm_params(params)

    mlm_Y_hat = masklm_forward(X, pred_positions, prepared)
    jax.block_until_ready(mlm_Y_hat)
    assert mlm_Y_hat.shape == (batch, pred_positions.shape[1], vocab_size)

    # Tight check vs a reference using the same bf16 operand precision.
    ref_bf16 = _reference_forward(X, pred_positions, params, jnp.bfloat16)
    assert jnp.allclose(mlm_Y_hat, ref_bf16, atol=2e-3, rtol=2e-3)
    # Loose check vs the pure-f32 reference (bf16 operand rounding).
    ref_f32 = _reference_forward(X, pred_positions, params, jnp.float32)
    assert jnp.allclose(mlm_Y_hat, ref_f32, atol=5e-2, rtol=5e-2)

    # Also exercise the reduced-writeback bf16-logits path.
    mlm_Y_hat_bf16 = masklm_forward(X, pred_positions, prepared,
                                    out_dtype=jnp.bfloat16)
    jax.block_until_ready(mlm_Y_hat_bf16)
    assert mlm_Y_hat_bf16.dtype == jnp.bfloat16
    assert jnp.allclose(mlm_Y_hat_bf16.astype(jnp.float32), ref_bf16,
                        atol=5e-2, rtol=5e-2)

    print("KERNEL_OK")
</pallas_src>

<mosaic_0001>
module attributes {stable_mosaic.version = 11 : i64} {
  func.func @_masklm_hidden_kernel(%arg0: i32, %arg1: memref<16x128xbf16, #tpu.memory_space<vmem>>, %arg2: memref<128x128xbf16, #tpu.memory_space<vmem>>, %arg3: memref<1x128xf32, #tpu.memory_space<vmem>>, %arg4: memref<1x128xf32, #tpu.memory_space<vmem>>, %arg5: memref<1x128xf32, #tpu.memory_space<vmem>>, %arg6: memref<16x128xbf16, #tpu.memory_space<vmem>>) attributes {dimension_semantics = [#tpu.dimension_semantics<parallel>], iteration_bounds = array<i64: 1>, scalar_prefetch = 0 : i64, scratch_operands = 0 : i64, tpu.core_type = #tpu.core_type<tc>, window_params = [{transform_indices = @transform_0, window_bounds = array<i64: 16, 128>}, {pipeline_mode = #tpu.pipeline_mode<synchronous>, transform_indices = @transform_1, window_bounds = array<i64: 128, 128>}, {pipeline_mode = #tpu.pipeline_mode<synchronous>, transform_indices = @transform_2, window_bounds = array<i64: 1, 128>}, {pipeline_mode = #tpu.pipeline_mode<synchronous>, transform_indices = @transform_3, window_bounds = array<i64: 1, 128>}, {pipeline_mode = #tpu.pipeline_mode<synchronous>, transform_indices = @transform_4, window_bounds = array<i64: 1, 128>}, {transform_indices = @transform_5, window_bounds = array<i64: 16, 128>}]} {
    %c0 = arith.constant 0 : index
    %c0_0 = arith.constant 0 : index
    %0 = vector.load %arg1[%c0, %c0_0] : memref<16x128xbf16, #tpu.memory_space<vmem>>, vector<16x128xbf16>
    %c0_1 = arith.constant 0 : index
    %c0_2 = arith.constant 0 : index
    %1 = vector.load %arg2[%c0_1, %c0_2] : memref<128x128xbf16, #tpu.memory_space<vmem>>, vector<128x128xbf16>
    %cst = arith.constant dense<0.000000e+00> : vector<16x128xf32>
    %2 = tpu.matmul %0, %1, %cst {dimension_numbers = #tpu.dot_dimension_numbers<[1], [0], [0], [1], [0, 0, 1, 1], [], []>} : vector<16x128xbf16>, vector<128x128xbf16>, vector<16x128xf32> -> vector<16x128xf32>
    %c0_3 = arith.constant 0 : index
    %c0_4 = arith.constant 0 : index
    %3 = vector.load %arg3[%c0_3, %c0_4] : memref<1x128xf32, #tpu.memory_space<vmem>>, vector<1x128xf32>
    %4 = vector.broadcast %3 : vector<1x128xf32> to vector<16x128xf32>
    %5 = arith.addf %2, %4 : vector<16x128xf32>
    %cst_5 = arith.constant 0.000000e+00 : f32
    %6 = vector.broadcast %cst_5 : f32 to vector<16x128xf32>
    %7 = arith.maximumf %5, %6 : vector<16x128xf32>
    %cst_6 = arith.constant dense<0.000000e+00> : vector<16xf32>
    %8 = vector.multi_reduction <add>, %7, %cst_6 [1] : vector<16x128xf32> to vector<16xf32>
    %9 = vector.shape_cast %8 : vector<16xf32> to vector<16x1xf32>
    %cst_7 = arith.constant 1.280000e+02 : f32
    %10 = vector.broadcast %cst_7 : f32 to vector<16x1xf32>
    %11 = arith.divf %9, %10 : vector<16x1xf32>
    %12 = vector.broadcast %11 : vector<16x1xf32> to vector<16x128xf32>
    %13 = arith.subf %7, %12 : vector<16x128xf32>
    %14 = arith.mulf %13, %13 : vector<16x128xf32>
    %cst_8 = arith.constant dense<0.000000e+00> : vector<16xf32>
    %15 = vector.multi_reduction <add>, %14, %cst_8 [1] : vector<16x128xf32> to vector<16xf32>
    %16 = vector.shape_cast %15 : vector<16xf32> to vector<16x1xf32>
    %cst_9 = arith.constant 1.280000e+02 : f32
    %17 = vector.broadcast %cst_9 : f32 to vector<16x1xf32>
    %18 = arith.divf %16, %17 : vector<16x1xf32>
    %19 = vector.broadcast %11 : vector<16x1xf32> to vector<16x128xf32>
    %20 = arith.subf %7, %19 : vector<16x128xf32>
    %cst_10 = arith.constant 9.99999974E-6 : f32
    %21 = vector.broadcast %cst_10 : f32 to vector<16x1xf32>
    %22 = arith.addf %18, %21 : vector<16x1xf32>
    %23 = math.rsqrt %22 : vector<16x1xf32>
    %24 = vector.broadcast %23 : vector<16x1xf32> to vector<16x128xf32>
    %25 = arith.mulf %20, %24 : vector<16x128xf32>
    %c0_11 = arith.constant 0 : index
    %c0_12 = arith.constant 0 : index
    %26 = vector.load %arg4[%c0_11, %c0_12] : memref<1x128xf32, #tpu.memory_space<vmem>>, vector<1x128xf32>
    %27 = vector.broadcast %26 : vector<1x128xf32> to vector<16x128xf32>
    %28 = arith.mulf %25, %27 : vector<16x128xf32>
    %c0_13 = arith.constant 0 : index
    %c0_14 = arith.constant 0 : index
    %29 = vector.load %arg5[%c0_13, %c0_14] : memref<1x128xf32, #tpu.memory_space<vmem>>, vector<1x128xf32>
    %30 = vector.broadcast %29 : vector<1x128xf32> to vector<16x128xf32>
    %31 = arith.addf %28, %30 : vector<16x128xf32>
    %32 = arith.truncf %31 : vector<16x128xf32> to vector<16x128xbf16>
    %c0_15 = arith.constant 0 : index
    %c0_16 = arith.constant 0 : index
    %33 = vector.load %arg6[%c0_15, %c0_16] : memref<16x128xbf16, #tpu.memory_space<vmem>>, vector<16x128xbf16>
    tpu.vector_store %arg6[%c0_15, %c0_16], %32 {strides = array<i32>} : memref<16x128xbf16, #tpu.memory_space<vmem>>, vector<16x128xbf16>,
    return
  }
  func.func @transform_0(%arg0: i32) -> (i32, i32) {
    %c0_i32 = arith.constant 0 : i32
    %c0_i32_0 = arith.constant 0 : i32
    return %arg0, %c0_i32 : i32, i32
  }
  func.func @transform_1(%arg0: i32) -> (i32, i32) {
    %c0_i32 = arith.constant 0 : i32
    %c0_i32_0 = arith.constant 0 : i32
    %c0_i32_1 = arith.constant 0 : i32
    return %c0_i32, %c0_i32_0 : i32, i32
  }
  func.func @transform_2(%arg0: i32) -> (i32, i32) {
    %c0_i32 = arith.constant 0 : i32
    %c0_i32_0 = arith.constant 0 : i32
    %c0_i32_1 = arith.constant 0 : i32
    return %c0_i32, %c0_i32_0 : i32, i32
  }
  func.func @transform_3(%arg0: i32) -> (i32, i32) {
    %c0_i32 = arith.constant 0 : i32
    %c0_i32_0 = arith.constant 0 : i32
    %c0_i32_1 = arith.constant 0 : i32
    return %c0_i32, %c0_i32_0 : i32, i32
  }
  func.func @transform_4(%arg0: i32) -> (i32, i32) {
    %c0_i32 = arith.constant 0 : i32
    %c0_i32_0 = arith.constant 0 : i32
    %c0_i32_1 = arith.constant 0 : i32
    return %c0_i32, %c0_i32_0 : i32, i32
  }
  func.func @transform_5(%arg0: i32) -> (i32, i32) {
    %c0_i32 = arith.constant 0 : i32
    %c0_i32_0 = arith.constant 0 : i32
    return %arg0, %c0_i32 : i32, i32
  }
}

</mosaic_0001>

<bundles_post_ra>
// kernel: tpu_custom_call.1
= control target key start
LH: loop header
LB: loop body
LE: loop exit
PB: predicated region body
PF: predicated region fallthrough
CT: control target
= control target key end

     0   :  { %10 = vsyncpa [#allocation3], 0  ;;  %s434_s0 = inlined_call_operand.hbm [shape: bf16[16,128], index: 0, kind: input, shape index: {}]   ;;  %s435_s1 = inlined_call_operand.hbm [shape: bf16[128,128], index: 1, kind: input, shape index: {}]   ;;  %s436_s2 = inlined_call_operand.vmem [shape: f32[1,128], index: 2, kind: input, shape index: {}]   ;;  %s437_s3 = inlined_call_operand.vmem [shape: f32[1,128], index: 3, kind: input, shape index: {}]   ;;  %s438_s4 = inlined_call_operand.vmem [shape: f32[1,128], index: 4, kind: input, shape index: {}]   ;;  %s439_s5 = inlined_call_operand.hbm [shape: bf16[16,128], index: 5, kind: output, shape index: {}]  }
   0x1   :  { %11 = vsyncpa [#allocation6], 0 }
   0x2   :  { %12 = vsyncpa [#allocation4], 0  ;;  %s17_s20 = sshll.u32 %s434_s0, 4  ;;  %s371_s21 = smov [#allocation2]   ;;  %s18_s20 = int_to_ptr.hbm [resolvable:$true] %s17_s20 }
   0x3   :  { %s19_s22 = sshll.u32 %s371_s21, 4  ;;  %s30_s25 = sshll.u32 %s435_s1, 4  ;;  %s20_s22 = int_to_ptr.vmem [resolvable:$true] %s19_s22  ;;  %s31_s25 = int_to_ptr.hbm [resolvable:$true] %s30_s25 }
   0x4   :  { %s372_s26 = smov 64   ;;  %s373_s27 = smov 4  }
   0x5   :  { %25 = dma.hbm_to_vmem [thread:$0]  %s18_s20, 128, %s20_s22, [#allocation3], %s372_s26, %s372_s26, %s373_s27  }
   0x6   :  { %s374_s28 = smov [#allocation5]  }
   0x7   :  { %s32_s29 = sshll.u32 %s374_s28, 4  ;;  %s33_s29 = int_to_ptr.vmem [resolvable:$true] %s32_s29 }
   0x8   :  { %38 = dma.hbm_to_vmem [thread:$0]  %s31_s25, 1024, %s33_s29, [#allocation6], %s372_s26, %s372_s26, %s373_s27  }
   0x9   :  { %365 = dma.done.wait [#allocation3], 128  }
   0xa   :  { %366 = vsyncadd [#allocation3], 4294967168 }
   0xb   :  { %367 = dma.done.wait [#allocation6], 1024  }
   0xc   :  { %368 = vsyncadd [#allocation6], 4294966272  ;;  %v272_v0 = vld [vmem:[#allocation5 + $0x38] sm:$0xff]  ;;  %v271_v1 = vld [vmem:[#allocation5 + $0x30] sm:$0xff]  ;;  %v375_v16 = vmov 128.0   ;;  %s376_s8 = smov [#allocation7]  }
   0xd   :  { %129 = vmatpush.bf16.msra.mxu0 %v272_v0  ;;  %v270_v2 = vld [vmem:[#allocation5 + $0x28] sm:$0xff]  ;;  %v269_v3 = vld [vmem:[#allocation5 + $0x20] sm:$0xff]  ;;  %v268_v4 = vld [vmem:[#allocation5 + $0x18] sm:$0xff]  ;;  %287 = vrcp.f32 %v375_v16  ;;  %s212_s9 = sshll.u32 %s376_s8, 4  ;;  %s214_s12 = sshll.u32 %s439_s5, 4  ;;  %s213_s9 = int_to_ptr.vmem [resolvable:$true] %s212_s9  ;;  %s215_s12 = int_to_ptr.hbm [resolvable:$true] %s214_s12 }
   0xe   :  { %v267_v5 = vld [vmem:[#allocation5 + $0x10] sm:$0xff]  ;;  %v266_v6 = vld [vmem:[#allocation5 + $0x8] sm:$0xff]  ;;  %v265_v7 = vld [vmem:[#allocation5] sm:$0xff] }
   0xf   :  { %v264_v8 = vld [vmem:[#allocation2] sm:$0xff] }
  0x10   :  { %v284_v9 = vld [vmem:[%s436_s2] ss:$0 sm:$0xff] }
  0x11   :  { %130 = vmatpush.bf16.msra.mxu0 %v271_v1  ;;  %v285_v50 = vld [vmem:[%s437_s3] ss:$0 sm:$0xff] }
  0x12   :  { %v286_v55 = vld [vmem:[%s438_s4] ss:$0 sm:$0xff] }
  0x13   :  { %v288_v17 = vpop.eup %287 }
  0x14   :  { %v150_v18 = vmul.f32 128.0, %v288_v17  ;;  %vm154_vm0 = vweird.f32 %v288_v17 }
  0x15   :  { %131 = vmatpush.bf16.msra.mxu0 %v270_v2 }
  0x16   :  { %v151_v19 = vsub.f32 1.0, %v150_v18 }
  0x18   :  { %v152_v20 = vmul.f32 %v288_v17, %v151_v19 }
  0x19   :  { %132 = vmatpush.bf16.msra.mxu0 %v269_v3 }
  0x1a   :  { %v153_v21 = vadd.f32 %v288_v17, %v152_v20 }
  0x1c   :  { %v155_v22 = vsel %vm154_vm0, %v288_v17, %v153_v21 }
  0x1d   :  { %133 = vmatpush.bf16.msra.mxu0 %v268_v4 }
  0x21   :  { %134 = vmatpush.bf16.msra.mxu0 %v267_v5 }
  0x25   :  { %135 = vmatpush.bf16.msra.mxu0 %v266_v6 }
  0x29   :  { %136 = vmatpush.bf16.msra.mxu0 %v265_v7 }
  0x2c   :  { %137 = vmatmul.bf16.vlgmr.msra.gmra.mxu0 %v264_v8 }
  0xa9   :  { %v138_v10 = vpop.f32.mrf.mxu0 }
  0xaa   :  { %v139_v11 = vadd.f32 %v284_v9, %v138_v10 }
  0xac   :  { %v143_v12 = vmax.f32 %v139_v11, 0.0 }
  0xae   :  { %145 = vadd.xlane.f32.xlu0 %v143_v12 }
  0xb1   :  { %v140_v13 = vpop.f32.mrf.mxu0 }
  0xb2   :  { %v141_v14 = vadd.f32 %v284_v9, %v140_v13 }
  0xb4   :  { %v144_v15 = vmax.f32 %v141_v14, 0.0 }
  0xb6   :  { %147 = vadd.xlane.f32.xlu0 %v144_v15 }
 0x121   :  { %v146_v23 = vpop.xlane.xlu0 %145 }
 0x122   :  { %v156_v24 = vmul.f32 %v155_v22, %v146_v23 }
 0x124   :  { %v158_v25 = vsub.f32 %v143_v12, %v156_v24 }
 0x126   :  { %v160_v26 = vmul.f32 %v158_v25, %v158_v25 }
 0x128   :  { %162 = vadd.xlane.f32.xlu1 %v160_v26 }
 0x129   :  { %v148_v27 = vpop.xlane.xlu0 %147 }
 0x12a   :  { %v157_v28 = vmul.f32 %v155_v22, %v148_v27 }
 0x12c   :  { %v159_v29 = vsub.f32 %v144_v15, %v157_v28 }
 0x12e   :  { %v161_v30 = vmul.f32 %v159_v29, %v159_v29 }
 0x130   :  { %164 = vadd.xlane.f32.xlu1 %v161_v30 }
 0x19b   :  { %v163_v31 = vpop.xlane.xlu1 %162 }
 0x19c   :  { %v166_v32 = vmul.f32 %v163_v31, %v155_v22 }
 0x19e   :  { %v168_v33 = vadd.f32 1e-05, %v166_v32 }
 0x1a0   :  { %289 = vrsqrt.f32 %v168_v33  ;;  %vm176_vm2 = vweird.f32 %v168_v33 }
 0x1a3   :  { %v165_v34 = vpop.xlane.xlu1 %164 }
 0x1a4   :  { %v167_v35 = vmul.f32 %v165_v34, %v155_v22 }
 0x1a6   :  { %v290_v36 = vpop.eup %289  ;;  %v169_v37 = vadd.f32 1e-05, %v167_v35 }
 0x1a7   :  { %v171_v38 = vmul.f32 %v290_v36, %v168_v33  ;;  %vm177_vm1 = vweird.f32 %v290_v36 }
 0x1a8   :  { %291 = vrsqrt.f32 %v169_v37  ;;  %vm178_vm3 = vmor %vm176_vm2, %vm177_vm1  ;;  %vm186_vm5 = vweird.f32 %v169_v37 }
 0x1a9   :  { %v172_v39 = vmul.f32 %v290_v36, %v171_v38 }
 0x1ab   :  { %v173_v40 = vmul.f32 0.5, %v172_v39 }
 0x1ad   :  { %v174_v41 = vsub.f32 1.5, %v173_v40 }
 0x1ae   :  { %v292_v42 = vpop.eup %291 }
 0x1af   :  { %v175_v43 = vmul.f32 %v290_v36, %v174_v41  ;;  %v181_v44 = vmul.f32 %v292_v42, %v169_v37  ;;  %vm187_vm4 = vweird.f32 %v292_v42 }
 0x1b0   :  { %vm188_vm6 = vmor %vm186_vm5, %vm187_vm4 }
 0x1b1   :  { %v182_v45 = vmul.f32 %v292_v42, %v181_v44  ;;  %v179_v46 = vsel %vm178_vm3, %v290_v36, %v175_v43 }
 0x1b2   :  { %v190_v49 = vmul.f32 %v179_v46, %v158_v25 }
 0x1b3   :  { %v183_v47 = vmul.f32 0.5, %v182_v45 }
 0x1b4   :  { %v196_v54 = vmul.f32 %v285_v50, %v190_v49 }
 0x1b5   :  { %v184_v48 = vsub.f32 1.5, %v183_v47 }
 0x1b6   :  { %v202_v57 = vadd.f32 %v286_v55, %v196_v54 }
 0x1b7   :  { %v185_v51 = vmul.f32 %v292_v42, %v184_v48 }
 0x1b9   :  { %v189_v52 = vsel %vm188_vm6, %v292_v42, %v185_v51 }
 0x1ba   :  { %v191_v53 = vmul.f32 %v189_v52, %v159_v29 }
 0x1bc   :  { %v197_v56 = vmul.f32 %v285_v50, %v191_v53 }
 0x1be   :  { %v203_v58 = vadd.f32 %v286_v55, %v197_v56 }
 0x1c0   :  { %v276_v59 = vpack.c.bf16 %v203_v58, %v202_v57 }
 0x1c2   :  { %277 = vst [vmem:[#allocation7] sm:$0xff] %v276_v59  }
 0x1c3   :  { %220 = dma.vmem_to_hbm [thread:$0]  %s213_s9, 128, %s215_s12, [#allocation4], %s372_s26, %s372_s26, %s373_s27  }
 0x1c4   :  { %369 = dma.done.wait [#allocation4], 128  }
 0x1c5   :  { %370 = vsyncadd [#allocation4], 4294967168 }
 0x1c6   :  { %225 = vsyncpa [#allocation3], 1 }
 0x1c7   :  { %226 = vsyncpa [#allocation6], 1 }
 0x1c8   :  { %227 = vsyncpa [#allocation4], 1 }

</bundles_post_ra>
